<compile_context>
chip_gen: v5e
topology: v5e:2x2
jax: 0.10.0
libtpu: 0.0.40
codegen_flags: <defaults>
</compile_context>

<pallas_src>
import math
import jax
import jax.numpy as jnp
from jax.experimental import pallas as pl
from jax.experimental.pallas import tpu as pltpu


# ----------------------- primary path: one HBM->HBM DMA ----------------------
def _hbm_memcpy_kernel(x_hbm_ref, o_hbm_ref, dma_sem):
    # Identity forward == memcpy.  Whole-slab DMA, shape-agnostic, no tiling
    # constraints, streams at HBM bandwidth on v5e / v6e / v7x.
    cp = pltpu.make_async_copy(x_hbm_ref, o_hbm_ref, dma_sem)
    cp.start()
    cp.wait()


def _identity_copy_dma(data):
    itemsize = jnp.dtype(data.dtype).itemsize
    nbytes = int(data.size) * itemsize
    return pl.pallas_call(
        _hbm_memcpy_kernel,
        out_shape=jax.ShapeDtypeStruct(data.shape, data.dtype),
        in_specs=[pl.BlockSpec(memory_space=pl.ANY)],
        out_specs=pl.BlockSpec(memory_space=pl.ANY),
        scratch_shapes=[pltpu.SemaphoreType.DMA(())],
        cost_estimate=pl.CostEstimate(
            flops=0, transcendentals=0, bytes_accessed=2 * nbytes),
    )(data)


# ------------------- fallback path: tiled VMEM streaming copy ----------------
def _tile_copy_kernel(x_ref, o_ref):
    o_ref[...] = x_ref[...]


def _round_up(x, m):
    return (x + m - 1) // m * m


def _identity_copy_tiled(data, *, lanes=512, target_tile_bytes=4 * 1024 * 1024):
    """Lane-dense (rows, lanes) streaming copy.  Only pads to the sublane
    granule (not to a full-tile multiple); the last grid step may be partial."""
    orig_shape, orig_dtype = data.shape, data.dtype
    itemsize = jnp.dtype(orig_dtype).itemsize
    n = int(data.size)

    # dtype-aware sublane granule: 8 (f32), 16 (bf16/f16), 32 (int8/fp8).
    granule = max(8, 32 // itemsize)

    rows = _round_up(pl.cdiv(n, lanes), granule)
    n_padded = rows * lanes
    flat = data.reshape(n)
    if n_padded != n:
        flat = jnp.pad(flat, (0, n_padded - n))
    x2d = flat.reshape(rows, lanes)

    # ~4 MiB tiles (~90-95% of roofline on v6e/v7x), capped by the array.
    rows_per_tile = max(granule, target_tile_bytes // (lanes * itemsize))
    tm = min(rows, _round_up(rows_per_tile, granule))
    grid = pl.cdiv(rows, tm)

    out2d = pl.pallas_call(
        _tile_copy_kernel,
        out_shape=jax.ShapeDtypeStruct((rows, lanes), orig_dtype),
        grid_spec=pltpu.PrefetchScalarGridSpec(
            num_scalar_prefetch=0,
            grid=(grid,),
            in_specs=[pl.BlockSpec((tm, lanes), lambda i: (i, 0))],
            out_specs=pl.BlockSpec((tm, lanes), lambda i: (i, 0)),
        ),
        compiler_params=pltpu.CompilerParams(
            dimension_semantics=("parallel",),   # megacore sharding on v7x
            vmem_limit_bytes=48 * 1024 * 1024,   # 4 MiB x 2 bufs x (in+out) = 16 MiB used
        ),
        cost_estimate=pl.CostEstimate(
            flops=0, transcendentals=0, bytes_accessed=2 * n_padded * itemsize),
    )(x2d)

    out_flat = out2d.reshape(n_padded)
    if n_padded != n:
        out_flat = out_flat[:n]
    return out_flat.reshape(orig_shape)


# --------------------------------- wrapper -----------------------------------
def proj_layer_forward(data):
    """ProjLayer.forward(data) == data.  The absolute fastest option is to
    return `data` unchanged (no kernel); when a freshly materialized output
    buffer is required we issue a single HBM->HBM DMA, falling back to a tiled
    VMEM streaming copy if the direct DMA path is unavailable."""
    if data.ndim == 0 or data.size == 0:
        return data  # nothing to copy; guards rows=0 / scalar edge cases
    try:
        return _identity_copy_dma(data)
    except Exception:
        return _identity_copy_tiled(data)


def init_proj_layer_params(emb_size, key):
    """Xavier-uniform 1x1-conv weight (emb_size, emb_size, 1, 1) and zero bias,
    matching ProjLayer._init_parameters.  Kept only for parameter parity."""
    fan_in = emb_size * 1 * 1
    fan_out = emb_size * 1 * 1
    limit = math.sqrt(6.0 / (fan_in + fan_out))
    weight = jax.random.uniform(
        key, (emb_size, emb_size, 1, 1), minval=-limit, maxval=limit,
        dtype=jnp.float32)
    bias = jnp.zeros((emb_size,), dtype=jnp.float32)
    return weight, bias


# TODO(synk): self.projection (1x1 Conv2d) and self.norm_out (InstanceNorm2d)
# are defined in __init__ but never invoked in the reference forward, so they
# are intentionally not fused into the kernel (forward semantics == identity).


if __name__ == "__main__":
    key = jax.random.PRNGKey(0)
    k_w, k_x, k_y = jax.random.split(key, 3)

    emb_size, cls_num = 4, 4
    batch, H, W = 2, 16, 16

    # Parameters exist on the module but are unused by forward (see TODO above).
    proj_w, proj_b = init_proj_layer_params(emb_size, k_w)

    # (1) Standard 4-D activation shape implied by the Conv2d/InstanceNorm2d.
    data = jax.random.normal(k_x, (batch, emb_size, H, W), dtype=jnp.float32)
    out = jax.block_until_ready(proj_layer_forward(data))
    assert out.shape == data.shape and out.dtype == data.dtype
    assert bool(jnp.array_equal(out, data))

    # (2) Ragged / non-128-multiple shape goes through the same shape-agnostic path.
    data2 = jax.random.normal(k_y, (3, 5, 7), dtype=jnp.float32)
    out2 = jax.block_until_ready(proj_layer_forward(data2))
    assert out2.shape == data2.shape
    assert bool(jnp.array_equal(out2, data2))

    # (3) Explicitly verify the tiled fallback as well.
    out3 = jax.block_until_ready(_identity_copy_tiled(data))
    assert bool(jnp.array_equal(out3, data))

    print("KERNEL_OK")
</pallas_src>

<mosaic_0001>
module attributes {stable_mosaic.version = 11 : i64} {
  func.func @_hbm_memcpy_kernel(%arg0: memref<2x4x16x16xf32, #tpu.memory_space<any>>, %arg1: memref<2x4x16x16xf32, #tpu.memory_space<any>>, %arg2: memref<!tpu.dma_semaphore, #tpu.memory_space<semaphore_mem>>) attributes {dimension_semantics = [], scalar_prefetch = 0 : i64, scratch_operands = 1 : i64, tpu.core_type = #tpu.core_type<tc>} {
    tpu.enqueue_dma source(%arg0 : memref<2x4x16x16xf32, #tpu.memory_space<any>>) target(%arg1 : memref<2x4x16x16xf32, #tpu.memory_space<any>>) target_semaphore(%arg2 : memref<!tpu.dma_semaphore, #tpu.memory_space<semaphore_mem>>)
    tpu.wait_dma2 semaphore(%arg2 : memref<!tpu.dma_semaphore, #tpu.memory_space<semaphore_mem>>) src(%arg0 : memref<2x4x16x16xf32, #tpu.memory_space<any>>) dst(%arg1 : memref<2x4x16x16xf32, #tpu.memory_space<any>>)
    return
  }
}

module attributes {stable_mosaic.version = 11 : i64} {
  func.func @_tile_copy_kernel(%arg0: i32, %arg1: memref<8x512xf32, #tpu.memory_space<vmem>>, %arg2: memref<8x512xf32, #tpu.memory_space<vmem>>) attributes {dimension_semantics = [#tpu.dimension_semantics<parallel>], iteration_bounds = array<i64: 1>, scalar_prefetch = 0 : i64, scratch_operands = 0 : i64, tpu.core_type = #tpu.core_type<tc>, window_params = [{transform_indices = @transform_0, window_bounds = array<i64: 8, 512>}, {transform_indices = @transform_1, window_bounds = array<i64: 8, 512>}]} {
    %c0 = arith.constant 0 : index
    %c0_0 = arith.constant 0 : index
    %0 = vector.load %arg1[%c0, %c0_0] : memref<8x512xf32, #tpu.memory_space<vmem>>, vector<8x512xf32>
    %c0_1 = arith.constant 0 : index
    %c0_2 = arith.constant 0 : index
    %1 = vector.load %arg2[%c0_1, %c0_2] : memref<8x512xf32, #tpu.memory_space<vmem>>, vector<8x512xf32>
    tpu.vector_store %arg2[%c0_1, %c0_2], %0 {strides = array<i32>} : memref<8x512xf32, #tpu.memory_space<vmem>>, vector<8x512xf32>,
    return
  }
  func.func @transform_0(%arg0: i32) -> (i32, i32) {
    %c0_i32 = arith.constant 0 : i32
    %c0_i32_0 = arith.constant 0 : i32
    return %arg0, %c0_i32 : i32, i32
  }
  func.func @transform_1(%arg0: i32) -> (i32, i32) {
    %c0_i32 = arith.constant 0 : i32
    %c0_i32_0 = arith.constant 0 : i32
    return %arg0, %c0_i32 : i32, i32
  }
}

</mosaic_0001>

<bundles_post_ra>
// kernel: tpu_custom_call.1
= control target key start
LH: loop header
LB: loop body
LE: loop exit
PB: predicated region body
PF: predicated region fallthrough
CT: control target
= control target key end

     0   :  { %s34_s12 = smov [#allocation2]   ;;  %s35_s13 = smov [#allocation3]   ;;  %s53_s0 = inlined_call_operand.hbm [shape: f32[2,4,16,16], index: 0, kind: input, shape index: {}]   ;;  %s54_s1 = inlined_call_operand.hbm [shape: f32[2,4,16,16], index: 1, kind: output, shape index: {}]  }
   0x1   :  { %s10_s8 = sshll.u32 %s53_s0, 4  ;;  %s12_s11 = sshll.u32 %s54_s1, 4  ;;  %s11_s8 = int_to_ptr.hbm [resolvable:$true] %s10_s8  ;;  %s13_s11 = int_to_ptr.hbm [resolvable:$true] %s12_s11 }
   0x2   :  { %s36_s14 = smov 0  }
   0x3   :  { %16 = dma.general %s11_s8, 2048, %s13_s11, %s34_s12, %s35_s13, [#allocation4], %s36_s14, 0  }
   0x4   :  { %32 = dma.done.wait [#allocation2], 2048 }
   0x5   :  { %33 = vsyncadd [#allocation2], 4294965248 }
   0x6   :  { %22 = vsyncmov [#allocation2] }
   0x9   :  { %s23_s15 = vpop.sfrf %22 }
   0xa   :  { %p28_p0 = scmp.ne.s32.totalorder %s23_s15, 0 }
   0xc   :  { %27 = shalt.err (%p28_p0)  }

// kernel: tpu_custom_call.1
= control target key start
LH: loop header
LB: loop body
LE: loop exit
PB: predicated region body
PF: predicated region fallthrough
CT: control target
= control target key end

     0   :  { %6 = vsyncpa [#allocation3], 0  ;;  %s120_s0 = inlined_call_operand.hbm [shape: f32[8,512], index: 0, kind: input, shape index: {}]   ;;  %s121_s1 = inlined_call_operand.hbm [shape: f32[8,512], index: 1, kind: output, shape index: {}]  }
   0x1   :  { %7 = vsyncpa [#allocation4], 0  ;;  %s13_s8 = sshll.u32 %s120_s0, 4  ;;  %s102_s9 = smov [#allocation2]   ;;  %s14_s8 = int_to_ptr.hbm [resolvable:$true] %s13_s8 }
   0x2   :  { %s15_s10 = sshll.u32 %s102_s9, 4  ;;  %s16_s10 = int_to_ptr.vmem [resolvable:$true] %s15_s10 }
   0x3   :  { %18 = dma.hbm_to_vmem [thread:$0]  %s14_s8, 512, %s16_s10, [#allocation3]  }
   0x4   :  { %98 = dma.done.wait [#allocation3], 512  }
   0x5   :  { %99 = vsyncadd [#allocation3], 4294966784  ;;  %s103_s11 = smov [#allocation5]   ;;  %s38_s15 = sshll.u32 %s121_s1, 4  ;;  %v23_v0 = vld [vmem:[#allocation2] sm:$0xff]  ;;  %v24_v1 = vld [vmem:[#allocation2 + $0x8] sm:$0xff]  ;;  %s39_s15 = int_to_ptr.hbm [resolvable:$true] %s38_s15 }
   0x6   :  { %s36_s12 = sshll.u32 %s103_s11, 4  ;;  %v25_v2 = vld [vmem:[#allocation2 + $0x10] sm:$0xff]  ;;  %27 = vst [vmem:[#allocation5] sm:$0xff] %v23_v0  ;;  %v26_v3 = vld [vmem:[#allocation2 + $0x18] sm:$0xff]  ;;  %s37_s12 = int_to_ptr.vmem [resolvable:$true] %s36_s12 }
   0x7   :  { %28 = vst [vmem:[#allocation5 + $0x8] sm:$0xff] %v24_v1 }
   0x8   :  { %29 = vst [vmem:[#allocation5 + $0x10] sm:$0xff] %v25_v2 }
   0x9   :  { %30 = vst [vmem:[#allocation5 + $0x18] sm:$0xff] %v26_v3 }
   0xa   :  { %41 = dma.vmem_to_hbm [thread:$0]  %s37_s12, 512, %s39_s15, [#allocation4]  }
   0xb   :  { %100 = dma.done.wait [#allocation4], 512  }
   0xc   :  { %101 = vsyncadd [#allocation4], 4294966784 }
   0xd   :  { %46 = vsyncpa [#allocation3], 1 }
   0xe   :  { %47 = vsyncpa [#allocation4], 1 }

</bundles_post_ra>
